<compile_context>
chip_gen: v7x
topology: tpu7x:2x2x1
jax: 0.10.0
libtpu: 0.0.40
codegen_flags: <defaults>
</compile_context>

<pallas_src>
import math
import functools

import jax
import jax.numpy as jnp
from jax import lax
from jax.experimental import pallas as pl
from jax.experimental.pallas import tpu as pltpu


# ----------------------------------------------------------------------------
# Kernel 1: LayerNorm + fused full-width Q/K/V projection
# ----------------------------------------------------------------------------
def _ln_qkv_kernel(x_ref, a2_ref, b2_ref, wqkv_ref, bqkv_ref,
                   q_ref, k_ref, v_ref, *, eps, d_model, d_k, compute_dtype):
    x = x_ref[0].astype(jnp.float32)                                  # (tr, D)
    mean = jnp.mean(x, axis=-1, keepdims=True)
    xc = x - mean
    # Annotated-Transformer LayerNorm: unbiased std, eps added to std (NOT to var).
    var = jnp.sum(xc * xc, axis=-1, keepdims=True) * (1.0 / (d_model - 1))
    inv_std = pl.reciprocal(jnp.sqrt(var) + eps,
                            approx=(compute_dtype != jnp.float32))
    xn = (a2_ref[...] * xc * inv_std + b2_ref[...]).astype(compute_dtype)

    # One fused (tr, D) @ (D, 3D) matmul; lane-dense (tr, D) stores for q/k/v.
    qkv = jnp.dot(xn, wqkv_ref[...], preferred_element_type=jnp.float32) + bqkv_ref[...]
    scale = 1.0 / math.sqrt(d_k)                                      # folded into q
    q_ref[0] = (qkv[:, :d_model] * scale).astype(q_ref.dtype)
    k_ref[0] = qkv[:, d_model:2 * d_model].astype(k_ref.dtype)
    v_ref[0] = qkv[:, 2 * d_model:].astype(v_ref.dtype)


# ----------------------------------------------------------------------------
# Kernel 2: flash attention (all heads per step) + output projection + residual
# ----------------------------------------------------------------------------
def _flash_attn_out_kernel(x_ref, q_ref, k_ref, v_ref, wo_ref, bo_ref, *rest,
                           num_heads, d_k, causal, compute_dtype):
    if causal:
        mask_ref = None
        out_ref, m_sc, l_sc, acc_sc = rest
    else:
        mask_ref, out_ref, m_sc, l_sc, acc_sc = rest

    qi = pl.program_id(1)
    ki = pl.program_id(2)
    nk = pl.num_programs(2)
    tq = q_ref.shape[1]
    tkv = k_ref.shape[1]
    f32 = jnp.float32
    # bf16 exp path targets v6e/v7x (bf16 EUP); pass compute_dtype=f32 on v5e.
    bf16_exp = compute_dtype != jnp.float32

    @pl.when(ki == 0)
    def _():
        m_sc[...] = jnp.full_like(m_sc, -jnp.inf)
        l_sc[...] = jnp.zeros_like(l_sc)
        acc_sc[...] = jnp.zeros_like(acc_sc)

    def attend():
        q = q_ref[0]                          # (tq, D) compute dtype, q pre-scaled
        k = k_ref[0]                          # (tkv, D)
        v = v_ref[0]
        # Mask is computed/loaded once per kv step and shared by all heads.
        if causal:
            row = qi * tq + lax.broadcasted_iota(jnp.int32, (tq, tkv), 0)
            col = ki * tkv + lax.broadcasted_iota(jnp.int32, (tq, tkv), 1)
            keep = row >= col
        else:
            keep = mask_ref[0].astype(f32) != 0.0

        for h in range(num_heads):            # static loop; heads share the grid step
            cs = slice(h * d_k, (h + 1) * d_k)     # head columns in q/k/v/acc
            hs = slice(h, h + 1)                   # head column in m/l
            # QK^T via dot_general contracting dims -> no materialized transpose.
            s = lax.dot_general(q[:, cs], k[:, cs], (((1,), (1,)), ((), ())),
                                preferred_element_type=f32)           # (tq, tkv)
            s = jnp.where(keep, s, f32(-1e9))
            m_prev = m_sc[:, hs]
            m_new = jnp.maximum(m_prev, jnp.max(s, axis=-1, keepdims=True))
            alpha = jnp.exp(m_prev - m_new)
            if bf16_exp:
                p = jnp.exp((s - m_new).astype(compute_dtype))        # bf16 EUP
                p_sum = jnp.sum(p.astype(f32), axis=-1, keepdims=True)
            else:
                p = jnp.exp(s - m_new)
                p_sum = jnp.sum(p, axis=-1, keepdims=True)
            pv = jnp.dot(p.astype(compute_dtype), v[:, cs],
                         preferred_element_type=f32)                  # (tq, d_k) f32
            l_sc[:, hs] = alpha * l_sc[:, hs] + p_sum
            acc_sc[:, cs] = alpha * acc_sc[:, cs] + pv
            m_sc[:, hs] = m_new

    if causal:
        # Skip compute for kv blocks fully above the diagonal (k/v index_map is clamped
        # there, so no DMA is issued either).
        pl.when(ki * tkv <= qi * tq + tq - 1)(attend)
    else:
        attend()

    @pl.when(ki == nk - 1)
    def _():
        inv_l = pl.reciprocal(l_sc[...], approx=(compute_dtype != jnp.float32))  # (tq,H)
        for h in range(num_heads):
            cs = slice(h * d_k, (h + 1) * d_k)
            acc_sc[:, cs] = acc_sc[:, cs] * inv_l[:, h:h + 1]
        head = acc_sc[...].astype(compute_dtype)                       # (tq, D)
        # Single packed (tq, D) @ (D, D) output projection; one f32 write of the block.
        y = jnp.dot(head, wo_ref[...], preferred_element_type=jnp.float32)
        out_ref[0] = (x_ref[0].astype(jnp.float32) + bo_ref[...] + y).astype(out_ref.dtype)


# ----------------------------------------------------------------------------
# Wrapper
# ----------------------------------------------------------------------------
def self_att_layer(x, tgt_mask, params, *, num_heads, eps=1e-6,
                   causal=False, compute_dtype=jnp.bfloat16,
                   row_tile=None, q_tile=None, kv_tile=None,
                   kv_buffers=None, vmem_limit_bytes=None):
    """x: (B, T, D); tgt_mask: (B, T, T) (0 == masked) or None when causal=True.

    Generation hints: on v5e use compute_dtype=f32 (no bf16 EUP/VPU) and smaller tiles
    (q_tile~128, kv_tile~256); on v6e/v7x keep bf16 and consider kv_buffers=3.
    """
    B, T, D = x.shape
    assert D % num_heads == 0
    d_k = D // num_heads
    H = num_heads
    cd = compute_dtype

    wq, bq, wk, bk, wv, bv, wo, bo, a2, b2 = params

    # Fused QKV weight (D, 3D) and output weight (D, D); constant index_maps keep them
    # resident in VMEM (DMA'd once, not per grid step).  Biases stay f32.
    wqkv = jnp.concatenate([wq, wk, wv], axis=1).astype(cd)            # (D, 3D)
    bqkv = jnp.concatenate([bq, bk, bv]).reshape(1, 3 * D).astype(jnp.float32)
    wo2 = wo.astype(cd)                                                # (D, D)
    bo2 = bo.reshape(1, D).astype(jnp.float32)
    a2r = a2.reshape(1, D).astype(jnp.float32)
    b2r = b2.reshape(1, D).astype(jnp.float32)

    tr = row_tile if row_tile is not None else min(T, 256)
    tq = q_tile if q_tile is not None else min(T, 256)
    tkv = kv_tile if kv_tile is not None else min(T, 256)
    assert T % tr == 0 and T % tq == 0 and T % tkv == 0

    def cparams(sem):
        kw = dict(dimension_semantics=sem)
        if vmem_limit_bytes is not None:       # do NOT blanket-set 64 MiB (v7x-unsafe)
            kw["vmem_limit_bytes"] = vmem_limit_bytes
        return pltpu.CompilerParams(**kw)

    # ---- Kernel 1: LayerNorm + fused QKV (q pre-scaled by 1/sqrt(d_k)) ----
    qkv_struct = jax.ShapeDtypeStruct((B, T, D), cd)
    q, k, v = pl.pallas_call(
        functools.partial(_ln_qkv_kernel, eps=eps, d_model=D, d_k=d_k, compute_dtype=cd),
        out_shape=(qkv_struct, qkv_struct, qkv_struct),
        grid_spec=pltpu.PrefetchScalarGridSpec(
            num_scalar_prefetch=0,
            grid=(B, T // tr),
            in_specs=[
                pl.BlockSpec((1, tr, D), lambda b, r: (b, r, 0)),      # x
                pl.BlockSpec((1, D), lambda b, r: (0, 0)),             # LN a_2
                pl.BlockSpec((1, D), lambda b, r: (0, 0)),             # LN b_2
                pl.BlockSpec((D, 3 * D), lambda b, r: (0, 0)),         # Wqkv (resident)
                pl.BlockSpec((1, 3 * D), lambda b, r: (0, 0)),         # bqkv
            ],
            out_specs=(
                pl.BlockSpec((1, tr, D), lambda b, r: (b, r, 0)),
                pl.BlockSpec((1, tr, D), lambda b, r: (b, r, 0)),
                pl.BlockSpec((1, tr, D), lambda b, r: (b, r, 0)),
            ),
        ),
        compiler_params=cparams(("parallel", "parallel")),
    )(x, a2r, b2r, wqkv, bqkv)

    # ---- Kernel 2: flash attention + output projection + residual ----
    if causal:
        def kv_map(b, qi2, ki2):
            # Clamp above-diagonal blocks to the last useful block -> no re-DMA for them.
            last = (qi2 * tq + tq - 1) // tkv
            return (b, jnp.minimum(ki2, last), 0)
    else:
        def kv_map(b, qi2, ki2):
            return (b, ki2, 0)

    kv_kwargs = {}
    if kv_buffers is not None:
        kv_kwargs["pipeline_mode"] = pl.Buffered(kv_buffers)

    in_specs = [
        pl.BlockSpec((1, tq, D), lambda b, qi2, ki2: (b, qi2, 0)),     # x (residual)
        pl.BlockSpec((1, tq, D), lambda b, qi2, ki2: (b, qi2, 0)),     # q (all heads)
        pl.BlockSpec((1, tkv, D), kv_map, **kv_kwargs),                # k (all heads)
        pl.BlockSpec((1, tkv, D), kv_map, **kv_kwargs),                # v (all heads)
        pl.BlockSpec((D, D), lambda b, qi2, ki2: (0, 0)),              # Wo (resident)
        pl.BlockSpec((1, D), lambda b, qi2, ki2: (0, 0)),              # bo
    ]
    inputs = [x, q, k, v, wo2, bo2]
    if not causal:
        assert tgt_mask is not None
        if tgt_mask.ndim == 4:                                         # (B,1,T,T) -> (B,T,T)
            tgt_mask = tgt_mask[:, 0]
        # int8 mask: 4x less HBM traffic than f32; fetched once per (b, q-tile, kv-tile).
        assert (tq % 32 == 0 or tq == T) and (tkv % 128 == 0 or tkv == T)
        in_specs.append(pl.BlockSpec((1, tq, tkv), lambda b, qi2, ki2: (b, qi2, ki2)))
        inputs.append(tgt_mask.astype(jnp.int8))
        # TODO(synk): for pure padding masks, prefetch per-row valid lengths
        # (PrefetchScalarGridSpec) and regenerate the mask in-kernel to drop it entirely.

    out = pl.pallas_call(
        functools.partial(_flash_attn_out_kernel, num_heads=H, d_k=d_k,
                          causal=causal, compute_dtype=cd),
        out_shape=jax.ShapeDtypeStruct((B, T, D), x.dtype),
        grid_spec=pltpu.PrefetchScalarGridSpec(
            num_scalar_prefetch=0,
            grid=(B, T // tq, T // tkv),
            in_specs=in_specs,
            out_specs=pl.BlockSpec((1, tq, D), lambda b, qi2, ki2: (b, qi2, 0)),
            scratch_shapes=[
                pltpu.VMEM((tq, H), jnp.float32),    # running max m (per head column)
                pltpu.VMEM((tq, H), jnp.float32),    # running sum l (per head column)
                pltpu.VMEM((tq, D), jnp.float32),    # per-head output accumulator
            ],
        ),
        compiler_params=cparams(("parallel", "parallel", "arbitrary")),
    )(*inputs)
    return out


# ----------------------------------------------------------------------------
# Pure-JAX reference (matches the PyTorch module in eval mode)
# ----------------------------------------------------------------------------
def _reference(x, tgt_mask, params, *, num_heads, eps=1e-6):
    wq, bq, wk, bk, wv, bv, wo, bo, a2, b2 = params
    B, T, D = x.shape
    d_k = D // num_heads
    mean = jnp.mean(x, axis=-1, keepdims=True)
    xc = x - mean
    std = jnp.sqrt(jnp.sum(xc * xc, axis=-1, keepdims=True) / (D - 1))
    xn = a2 * xc / (std + eps) + b2
    q = xn @ wq + bq
    k = xn @ wk + bk
    v = xn @ wv + bv
    q = q.reshape(B, T, num_heads, d_k).transpose(0, 2, 1, 3)
    k = k.reshape(B, T, num_heads, d_k).transpose(0, 2, 1, 3)
    v = v.reshape(B, T, num_heads, d_k).transpose(0, 2, 1, 3)
    s = jnp.einsum("bhqd,bhkd->bhqk", q, k) / math.sqrt(d_k)
    s = jnp.where(tgt_mask[:, None, :, :] == 0, -1e9, s)
    p = jax.nn.softmax(s, axis=-1)
    o = jnp.einsum("bhqk,bhkd->bhqd", p, v).transpose(0, 2, 1, 3).reshape(B, T, D)
    return x + o @ wo + bo


if __name__ == "__main__":
    B, T, D, H = 2, 32, 32, 4      # batch, seq, d_model (size), num heads

    key = jax.random.PRNGKey(0)
    keys = jax.random.split(key, 12)
    std = 1.0 / math.sqrt(D)

    x = jax.random.normal(keys[0], (B, T, D), jnp.float32)
    tgt_mask = jnp.tril(jnp.ones((T, T), jnp.float32))[None].repeat(B, axis=0)

    params = (
        jax.random.normal(keys[1], (D, D), jnp.float32) * std,   # Wq (in,out)
        jax.random.normal(keys[2], (D,), jnp.float32) * std,     # bq
        jax.random.normal(keys[3], (D, D), jnp.float32) * std,   # Wk
        jax.random.normal(keys[4], (D,), jnp.float32) * std,     # bk
        jax.random.normal(keys[5], (D, D), jnp.float32) * std,   # Wv
        jax.random.normal(keys[6], (D,), jnp.float32) * std,     # bv
        jax.random.normal(keys[7], (D, D), jnp.float32) * std,   # Wo
        jax.random.normal(keys[8], (D,), jnp.float32) * std,     # bo
        jnp.ones((D,), jnp.float32),                             # LayerNorm a_2
        jnp.zeros((D,), jnp.float32),                            # LayerNorm b_2
    )

    ref = _reference(x, tgt_mask, params, num_heads=H)

    # 1) exact f32 path, explicit int8 mask (full-T q/kv tiles keep the mask block full-dim)
    out_f32_mask = self_att_layer(x, tgt_mask, params, num_heads=H,
                                  causal=False, compute_dtype=jnp.float32,
                                  row_tile=16, q_tile=T, kv_tile=T)
    out_f32_mask = jax.block_until_ready(out_f32_mask)
    assert out_f32_mask.shape == (B, T, D)
    assert jnp.allclose(out_f32_mask, ref, atol=1e-4, rtol=1e-4)

    # 2) exact f32 path, causal mask generated in-kernel, flash q/kv tiling exercised
    out_f32_causal = self_att_layer(x, None, params, num_heads=H,
                                    causal=True, compute_dtype=jnp.float32,
                                    row_tile=16, q_tile=16, kv_tile=16)
    out_f32_causal = jax.block_until_ready(out_f32_causal)
    assert jnp.allclose(out_f32_causal, ref, atol=1e-4, rtol=1e-4)

    # 3) performance path: bf16 MXU operands + bf16 exp + in-kernel causal mask + tiling
    out_bf16 = self_att_layer(x, None, params, num_heads=H,
                              causal=True, compute_dtype=jnp.bfloat16,
                              row_tile=16, q_tile=16, kv_tile=16)
    out_bf16 = jax.block_until_ready(out_bf16)
    assert jnp.allclose(out_bf16, ref, atol=1e-1, rtol=1e-1)   # bf16 operand tolerance

    print("KERNEL_OK")
</pallas_src>

<mosaic_0001>
module attributes {stable_mosaic.version = 11 : i64} {
  func.func @_ln_qkv_kernel(%arg0: i32, %arg1: i32, %arg2: memref<1x16x32xf32, #tpu.memory_space<vmem>>, %arg3: memref<1x32xf32, #tpu.memory_space<vmem>>, %arg4: memref<1x32xf32, #tpu.memory_space<vmem>>, %arg5: memref<32x96xf32, #tpu.memory_space<vmem>>, %arg6: memref<1x96xf32, #tpu.memory_space<vmem>>, %arg7: memref<1x16x32xf32, #tpu.memory_space<vmem>>, %arg8: memref<1x16x32xf32, #tpu.memory_space<vmem>>, %arg9: memref<1x16x32xf32, #tpu.memory_space<vmem>>) attributes {dimension_semantics = [#tpu.dimension_semantics<parallel>, #tpu.dimension_semantics<parallel>], iteration_bounds = array<i64: 2, 2>, scalar_prefetch = 0 : i64, scratch_operands = 0 : i64, tpu.core_type = #tpu.core_type<tc>, window_params = [{transform_indices = @transform_0, window_bounds = array<i64: 1, 16, 32>}, {pipeline_mode = #tpu.pipeline_mode<synchronous>, transform_indices = @transform_1, window_bounds = array<i64: 1, 32>}, {pipeline_mode = #tpu.pipeline_mode<synchronous>, transform_indices = @transform_2, window_bounds = array<i64: 1, 32>}, {pipeline_mode = #tpu.pipeline_mode<synchronous>, transform_indices = @transform_3, window_bounds = array<i64: 32, 96>}, {pipeline_mode = #tpu.pipeline_mode<synchronous>, transform_indices = @transform_4, window_bounds = array<i64: 1, 96>}, {transform_indices = @transform_5, window_bounds = array<i64: 1, 16, 32>}, {transform_indices = @transform_6, window_bounds = array<i64: 1, 16, 32>}, {transform_indices = @transform_7, window_bounds = array<i64: 1, 16, 32>}]} {
    %c0 = arith.constant 0 : index
    %c0_0 = arith.constant 0 : index
    %c0_1 = arith.constant 0 : index
    %0 = vector.load %arg2[%c0, %c0_0, %c0_1] : memref<1x16x32xf32, #tpu.memory_space<vmem>>, vector<1x16x32xf32>
    %1 = vector.shape_cast %0 : vector<1x16x32xf32> to vector<16x32xf32>
    %cst = arith.constant dense<0.000000e+00> : vector<16xf32>
    %2 = vector.multi_reduction <add>, %1, %cst [1] : vector<16x32xf32> to vector<16xf32>
    %3 = vector.shape_cast %2 : vector<16xf32> to vector<16x1xf32>
    %cst_2 = arith.constant 3.200000e+01 : f32
    %4 = vector.broadcast %cst_2 : f32 to vector<16x1xf32>
    %5 = arith.divf %3, %4 : vector<16x1xf32>
    %6 = vector.broadcast %5 : vector<16x1xf32> to vector<16x32xf32>
    %7 = arith.subf %1, %6 : vector<16x32xf32>
    %8 = arith.mulf %7, %7 : vector<16x32xf32>
    %cst_3 = arith.constant dense<0.000000e+00> : vector<16xf32>
    %9 = vector.multi_reduction <add>, %8, %cst_3 [1] : vector<16x32xf32> to vector<16xf32>
    %10 = vector.shape_cast %9 : vector<16xf32> to vector<16x1xf32>
    %cst_4 = arith.constant 0.0322580636 : f32
    %11 = vector.broadcast %cst_4 : f32 to vector<16x1xf32>
    %12 = arith.mulf %10, %11 : vector<16x1xf32>
    %13 = math.sqrt %12 : vector<16x1xf32>
    %cst_5 = arith.constant 9.99999997E-7 : f32
    %14 = vector.broadcast %cst_5 : f32 to vector<16x1xf32>
    %15 = arith.addf %13, %14 : vector<16x1xf32>
    %16 = tpu.reciprocal %15 : vector<16x1xf32> -> vector<16x1xf32>
    %c0_6 = arith.constant 0 : index
    %c0_7 = arith.constant 0 : index
    %17 = vector.load %arg3[%c0_6, %c0_7] : memref<1x32xf32, #tpu.memory_space<vmem>>, vector<1x32xf32>
    %18 = vector.broadcast %17 : vector<1x32xf32> to vector<16x32xf32>
    %19 = arith.mulf %18, %7 : vector<16x32xf32>
    %20 = vector.broadcast %16 : vector<16x1xf32> to vector<16x32xf32>
    %21 = arith.mulf %19, %20 : vector<16x32xf32>
    %c0_8 = arith.constant 0 : index
    %c0_9 = arith.constant 0 : index
    %22 = vector.load %arg4[%c0_8, %c0_9] : memref<1x32xf32, #tpu.memory_space<vmem>>, vector<1x32xf32>
    %23 = vector.broadcast %22 : vector<1x32xf32> to vector<16x32xf32>
    %24 = arith.addf %21, %23 : vector<16x32xf32>
    %c0_10 = arith.constant 0 : index
    %c0_11 = arith.constant 0 : index
    %25 = vector.load %arg5[%c0_10, %c0_11] : memref<32x96xf32, #tpu.memory_space<vmem>>, vector<32x96xf32>
    %cst_12 = arith.constant dense<0.000000e+00> : vector<16x96xf32>
    %26 = tpu.matmul %24, %25, %cst_12 {dimension_numbers = #tpu.dot_dimension_numbers<[1], [0], [0], [1], [0, 0, 1, 1], [], []>} : vector<16x32xf32>, vector<32x96xf32>, vector<16x96xf32> -> vector<16x96xf32>
    %c0_13 = arith.constant 0 : index
    %c0_14 = arith.constant 0 : index
    %27 = vector.load %arg6[%c0_13, %c0_14] : memref<1x96xf32, #tpu.memory_space<vmem>>, vector<1x96xf32>
    %28 = vector.broadcast %27 : vector<1x96xf32> to vector<16x96xf32>
    %29 = arith.addf %26, %28 : vector<16x96xf32>
    %30 = vector.extract_strided_slice %29 {offsets = [0, 0], sizes = [16, 32], strides = [1, 1]} : vector<16x96xf32> to vector<16x32xf32>
    %cst_15 = arith.constant 0.353553385 : f32
    %31 = vector.broadcast %cst_15 : f32 to vector<16x32xf32>
    %32 = arith.mulf %30, %31 : vector<16x32xf32>
    %c0_16 = arith.constant 0 : index
    %c0_17 = arith.constant 0 : index
    %c0_18 = arith.constant 0 : index
    %33 = vector.load %arg7[%c0_16, %c0_17, %c0_18] : memref<1x16x32xf32, #tpu.memory_space<vmem>>, vector<1x16x32xf32>
    %34 = vector.shape_cast %33 : vector<1x16x32xf32> to vector<16x32xf32>
    %35 = vector.shape_cast %32 : vector<16x32xf32> to vector<1x16x32xf32>
    tpu.vector_store %arg7[%c0_16, %c0_17, %c0_18], %35 {strides = array<i32>} : memref<1x16x32xf32, #tpu.memory_space<vmem>>, vector<1x16x32xf32>,
    %36 = vector.extract_strided_slice %29 {offsets = [0, 32], sizes = [16, 32], strides = [1, 1]} : vector<16x96xf32> to vector<16x32xf32>
    %c0_19 = arith.constant 0 : index
    %c0_20 = arith.constant 0 : index
    %c0_21 = arith.constant 0 : index
    %37 = vector.load %arg8[%c0_19, %c0_20, %c0_21] : memref<1x16x32xf32, #tpu.memory_space<vmem>>, vector<1x16x32xf32>
    %38 = vector.shape_cast %37 : vector<1x16x32xf32> to vector<16x32xf32>
    %39 = vector.shape_cast %36 : vector<16x32xf32> to vector<1x16x32xf32>
    tpu.vector_store %arg8[%c0_19, %c0_20, %c0_21], %39 {strides = array<i32>} : memref<1x16x32xf32, #tpu.memory_space<vmem>>, vector<1x16x32xf32>,
    %40 = vector.extract_strided_slice %29 {offsets = [0, 64], sizes = [16, 32], strides = [1, 1]} : vector<16x96xf32> to vector<16x32xf32>
    %c0_22 = arith.constant 0 : index
    %c0_23 = arith.constant 0 : index
    %c0_24 = arith.constant 0 : index
    %41 = vector.load %arg9[%c0_22, %c0_23, %c0_24] : memref<1x16x32xf32, #tpu.memory_space<vmem>>, vector<1x16x32xf32>
    %42 = vector.shape_cast %41 : vector<1x16x32xf32> to vector<16x32xf32>
    %43 = vector.shape_cast %40 : vector<16x32xf32> to vector<1x16x32xf32>
    tpu.vector_store %arg9[%c0_22, %c0_23, %c0_24], %43 {strides = array<i32>} : memref<1x16x32xf32, #tpu.memory_space<vmem>>, vector<1x16x32xf32>,
    return
  }
  func.func @transform_0(%arg0: i32, %arg1: i32) -> (i32, i32, i32) {
    %c0_i32 = arith.constant 0 : i32
    %c0_i32_0 = arith.constant 0 : i32
    return %arg0, %arg1, %c0_i32 : i32, i32, i32
  }
  func.func @transform_1(%arg0: i32, %arg1: i32) -> (i32, i32) {
    %c0_i32 = arith.constant 0 : i32
    %c0_i32_0 = arith.constant 0 : i32
    %c0_i32_1 = arith.constant 0 : i32
    return %c0_i32, %c0_i32_0 : i32, i32
  }
  func.func @transform_2(%arg0: i32, %arg1: i32) -> (i32, i32) {
    %c0_i32 = arith.constant 0 : i32
    %c0_i32_0 = arith.constant 0 : i32
    %c0_i32_1 = arith.constant 0 : i32
    return %c0_i32, %c0_i32_0 : i32, i32
  }
  func.func @transform_3(%arg0: i32, %arg1: i32) -> (i32, i32) {
    %c0_i32 = arith.constant 0 : i32
    %c0_i32_0 = arith.constant 0 : i32
    %c0_i32_1 = arith.constant 0 : i32
    return %c0_i32, %c0_i32_0 : i32, i32
  }
  func.func @transform_4(%arg0: i32, %arg1: i32) -> (i32, i32) {
    %c0_i32 = arith.constant 0 : i32
    %c0_i32_0 = arith.constant 0 : i32
    %c0_i32_1 = arith.constant 0 : i32
    return %c0_i32, %c0_i32_0 : i32, i32
  }
  func.func @transform_5(%arg0: i32, %arg1: i32) -> (i32, i32, i32) {
    %c0_i32 = arith.constant 0 : i32
    %c0_i32_0 = arith.constant 0 : i32
    return %arg0, %arg1, %c0_i32 : i32, i32, i32
  }
  func.func @transform_6(%arg0: i32, %arg1: i32) -> (i32, i32, i32) {
    %c0_i32 = arith.constant 0 : i32
    %c0_i32_0 = arith.constant 0 : i32
    return %arg0, %arg1, %c0_i32 : i32, i32, i32
  }
  func.func @transform_7(%arg0: i32, %arg1: i32) -> (i32, i32, i32) {
    %c0_i32 = arith.constant 0 : i32
    %c0_i32_0 = arith.constant 0 : i32
    return %arg0, %arg1, %c0_i32 : i32, i32, i32
  }
}

</mosaic_0001>

<bundles_post_ra>
// kernel: tpu_custom_call.1
= control target key start
LH: loop header
LB: loop body
LE: loop exit
PB: predicated region body
PF: predicated region fallthrough
CT: control target
= control target key end

     0   :  { %s1559_s0 = inlined_call_operand.hbm [shape: f32[2,32,32], index: 0, kind: input, shape index: {}]   ;;  %s1560_s1 = inlined_call_operand.vmem [shape: f32[1,32], index: 1, kind: input, shape index: {}]   ;;  %s1561_s2 = inlined_call_operand.vmem [shape: f32[1,32], index: 2, kind: input, shape index: {}]   ;;  %s1562_s3 = inlined_call_operand.hbm [shape: f32[32,96], index: 3, kind: input, shape index: {}]   ;;  %s1563_s4 = inlined_call_operand.vmem [shape: f32[1,96], index: 4, kind: input, shape index: {}]   ;;  %s1564_s5 = inlined_call_operand.hbm [shape: f32[2,32,32], index: 5, kind: output, shape index: {0}]   ;;  %s1565_s6 = inlined_call_operand.hbm [shape: f32[2,32,32], index: 6, kind: output, shape index: {1}]   ;;  %s1566_s7 = inlined_call_operand.hbm [shape: f32[2,32,32], index: 7, kind: output, shape index: {2}]  }
   0x1   :  { %1581 = sst [smem:[#allocation20_spill]] %s1562_s3 }
   0x2   :  { %1582 = sst [smem:[#allocation21_spill]] %s1564_s5 }
   0x3   :  { %1583 = sst [smem:[#allocation22_spill]] %s1565_s6 }
   0x4   :  { %1584 = sst [smem:[#allocation23_spill]] %s1566_s7 }
   0x5   :  { %13 = vsyncpa [#allocation3], 0 }
   0x6   :  { %15 = vsyncpa [#allocation3 + $0x1], 0 }
   0x7   :  { %16 = vsyncpa [#allocation6], 0 }
   0x8   :  { %17 = vsyncpa [#allocation4], 0 }
   0x9   :  { %19 = vsyncpa [#allocation4 + $0x1], 0 }
   0xa   :  { %20 = vsyncpa [#allocation9], 0 }
   0xb   :  { %22 = vsyncpa [#allocation9 + $0x1], 0  ;;  %s1206_s24 = smov 0   ;;  %s1208_s25 = smov 0  }
   0xc   :  { %s1210_s26 = smov 0   ;;  %s1212_s27 = smov 0  }
   0xd   :  { %s1214_s28 = smov 0   ;;  %s1216_s29 = smov 0  }
   0xe   :  { %s1218_s30 = smov 0   ;;  %s1220_s8 = smov 0  }
   0xf LB: > { %1585 = sst [smem:[#allocation15_spill]] %s1125_s24  ;;  %s1247_s9 = sadd.s32 4294967295, %s1153_s8   ;;  %s1153_s8 = sphi %s1220_s8, %s28_s8   ;;  %s1149_s30 = sphi %s1218_s30, %s1621_s30   ;;  %s1145_s29 = sphi %s1216_s29, %s1614_s29   ;;  %s1141_s28 = sphi %s1214_s28, %s1620_s28   ;;  %s1137_s27 = sphi %s1212_s27, %s1619_s27   ;;  %s1133_s26 = sphi %s1210_s26, %s1618_s26   ;;  %s1129_s25 = sphi %s1208_s25, %s1617_s25   ;;  %s1125_s24 = sphi %s1206_s24, %s1616_s24  }
  0x10   : > { %1586 = sst [smem:[#allocation16_spill]] %s1145_s29  ;;  %s1570_s10 = sadd.s32 4294967294, %s1153_s8  }
  0x11   : > { %p62_p0 = scmp.ne.s32.totalorder %s1129_s25, %s1125_s24  ;;  %p1567_p1 = scmp.eq.s32.totalorder %s1247_s9, 0 }
  0x12   : > { %p178_p3 = scmp.eq.s32.totalorder %s1570_s10, 3  ;;  %p763_p5 = scmp.ge.s32.totalorder %s1153_s8, 1 }
  0x13   : > { %p1258_p4 = por %p1567_p1, %p62_p0  ;;  %p241_p7 = scmp.lt.s32.totalorder %s1153_s8, 5 }
  0x14   : > { %p1263_p6 = por %p178_p3, %p62_p0  ;;  %s1155_s14 = smov [#allocation5]  }
  0x15   : > { %s1587_s11 = scalar_select %p1258_p4, 1, 0 }
  0x16   : > { %s1588_s12 = scalar_select %p1263_p6, 1, 0 }
  0x17   : > { %p1268_p8 = pnand %p763_p5, %p241_p7  ;;  %s259_s15 = sshll.u32 %s1155_s14, 4  ;;  %s260_s15 = int_to_ptr.vmem [resolvable:$true] %s259_s15 }
  0x18   : > { %1589 = sst [smem:[#allocation17_spill]] %s1588_s12 }
  0x19   : > { %s1590_s13 = scalar_select %p1268_p8, 1, 0 }
  0x1a   : > { %p832_p9 = pneg %p1268_p8  ;;  %s1592_s3 = sld [smem:[#allocation20_spill]] }
  0x1c   : > { %p1276_p10 = pnand %p832_p9, %p1567_p1 }
  0x1e   : > { %p935_p12 = pneg %p1276_p10 }
  0x20   : > { %s933_s19 = scalar_lea.hbm %s1592_s3, 512 }
  0x21   : > { %p934_p11 = scmp.ne.s32.totalorder %s1592_s3, %s933_s19  ;;  %p940_p3 = scmp.lt.u32.totalorder %s933_s19, %s1592_s3 }
  0x23   : > { %p936_p13 = pnand %p935_p12, %p934_p11 }
  0x25   : > { %p937_p0 = pneg %p936_p13 }
  0x27   : > { %p942_p5 = pnand %p940_p3, %p937_p0 }
  0x29   : > { %945 = shalt.err (!%p942_p5)
}
  0x2a   : > { %s946_s14 = scalar_lea.vmem %s260_s15, 512  ;;  %p954_p2 = scmp.lt.s32.totalorder %s260_s15, %s260_s15 }
  0x2b   : > { %p947_p7 = scmp.ne.s32.totalorder %s260_s15, %s946_s14  ;;  %p955_p6 = scmp.lt.s32.totalorder %s946_s14, %s946_s14 }
  0x2d   : > { %p949_p9 = pnand %p947_p7, %p935_p12  ;;  %p956_p4 = por %p955_p6, %p954_p2 }
  0x2f   : > { %p950_p1 = pneg %p949_p9 }
  0x31   : > { %p957_p8 = pnand %p956_p4, %p950_p1 }
  0x33   : > { %960 = shalt.err (!%p957_p8)
}
  0x34   : > { %s1571_s17 = smov 128   ;;  %s1572_s18 = smov 8  }
  0x35   : > { %835 = dma.hbm_to_vmem [thread:$0]  (!%p1276_p10), %s1592_s3, 512, %s260_s15, [#allocation6], %s1571_s17, %s1571_s17, %s1572_s18  }
  0x36   : > { %s37_s21 = sadd.s32 1, %s1145_s29  ;;  %s40_s22 = sadd.s32 1, %s1149_s30 }
  0x37   : > { %p38_p1 = scmp.ge.s32.totalorder %s37_s21, 2  ;;  %s49_s23 = sadd.s32 1, %s1133_s26 }
  0x38   : > { %p56_p2 = scmp.ne.s32.totalorder %s1133_s26, %s1129_s25  ;;  %p57_p4 = scmp.eq.s32.totalorder %s1153_s8, 0 }
  0x39   : > { %s1623_s21 = smov (%p38_p1, %s37_s21), 0  ;;  %s1625_s22 = smov (!%p38_p1, %s40_s22), %s1149_s30 }
  0x3a   : > { %1593 = sst [smem:[#allocation18_spill]] %s1623_s21  ;;  %s45_s16 = ssub.s32 %s1145_s29, %s1623_s21 }
  0x3b   : > { %p42_p6 = scmp.ge.s32.totalorder %s1625_s22, 2  ;;  %p1594_p8 = scmp.eq.s32.totalorder %s1247_s9, 3 }
  0x3c   : > { %p1316_p10 = por %p57_p4, %p56_p2  ;;  %p851_p12 = scmp.lt.s32.totalorder %s1153_s8, 4 }
  0x3d   : > { %p1312_p11 = por %p1594_p8, %p56_p2  ;;  %s1627_s22 = smov (%p42_p6, %s1625_s22), 0 }
  0x3e   : > { %1597 = sst [smem:[#allocation19_spill]] %s1627_s22  ;;  %s276_s19 = sand.u32 1, %s1133_s26  }
  0x3f   : > { %s767_s20 = sshll.u32 %s1145_s29, 1  ;;  %s44_s10 = ssub.s32 %s1149_s30, %s1627_s22 }
  0x40   : > { %s46_s17 = sor.u32 %s45_s16, %s44_s10  ;;  %s766_s18 = sshll.u32 %s276_s19, 4 }
  0x41   : > { %p47_p13 = scmp.eq.s32.totalorder %s46_s17, 0  ;;  %s768_s3 = sshll.u32 %s1149_s30, 2 }
  0x42   : > { %s280_s21 = scalar_lea.vmem [#allocation2], %s766_s18  ;;  %s286_s7 = sadd.s32 %s768_s3, %s767_s20 }
  0x43   : > { %s289_s12 = sshll.u32 %s280_s21, 4  ;;  %s769_s6 = sshll.u32 %s286_s7, 7  ;;  %s1331_s12 = int_to_ptr.vmem [resolvable:$true] %s289_s12 }
  0x44   : > { %s1329_s24 = scalar_select %p47_p13, %s1133_s26, %s49_s23  }
  0x45   : > { %p1337_p0 = pnand %p851_p12, %p1316_p10  ;;  %s1344_s10 = scalar_lea.hbm %s1559_s0, %s769_s6 }
  0x46   : > { %s1346_s3 = scalar_lea.sflag [#allocation3], %s276_s19  ;;  %s961_s7 = scalar_lea.hbm %s1344_s10, 256 }
  0x47   : > { %p962_p3 = scmp.ne.s32.totalorder %s1344_s10, %s961_s7  ;;  %p963_p5 = pneg %p1337_p0 }
  0x48   : > { %s966_s18 = scalar_lea.hbm %s1559_s0, 1024  ;;  %p967_p1 = scmp.lt.u32.totalorder %s1344_s10, %s1559_s0 }
  0x49   : > { %p964_p7 = pnand %p963_p5, %p962_p3  ;;  %p968_p2 = scmp.lt.u32.totalorder %s966_s18, %s961_s7 }
  0x4a   : > { %p970_p6 = scmp.lt.u32.totalorder %s961_s7, %s1344_s10 }
  0x4b   : > { %p965_p9 = pneg %p964_p7  ;;  %p969_p4 = por %p968_p2, %p967_p1 }
  0x4d   : > { %p971_p8 = por %p970_p6, %p969_p4 }
  0x4f   : > { %p972_p10 = pnand %p971_p8, %p965_p9 }
  0x51   : > { %975 = shalt.err (!%p972_p10)
}
  0x52   : > { %s976_s22 = scalar_lea.vmem %s1331_s12, 256  ;;  %s1158_s23 = smov [#allocation2]  }
  0x53   : > { %p977_p12 = scmp.ne.s32.totalorder %s1331_s12, %s976_s22  ;;  %s981_s16 = sshll.u32 %s1158_s23, 4  ;;  %s982_s16 = int_to_ptr.vmem [resolvable:$false] %s981_s16 }
  0x54   : > { %s983_s15 = scalar_lea.vmem %s982_s16, 512  ;;  %p984_p7 = scmp.lt.s32.totalorder %s1331_s12, %s982_s16 }
  0x55   : > { %p979_p13 = pnand %p977_p12, %p963_p5  ;;  %p985_p1 = scmp.lt.s32.totalorder %s983_s15, %s976_s22 }
  0x57   : > { %p980_p3 = pneg %p979_p13  ;;  %p986_p2 = por %p985_p1, %p984_p7 }
  0x59   : > { %p987_p4 = pnand %p986_p2, %p980_p3 }
  0x5b   : > { %990 = shalt.err (!%p987_p4)
}
  0x5c   : > { %s1599_s19 = smov 8   ;;  %s1600_s20 = smov 128  }
  0x5d   : > { %839 = dma.hbm_to_vmem [thread:$0]  (!%p1337_p0), %s1344_s10, 256, %s1331_s12, %s1346_s3, %s1600_s20, %s1600_s20, %s1599_s19  }
  0x5e   : > { %p1601_p5 = scmp.ne.s32.totalorder %s1590_s13, 0 }
  0x5f   : > { %s1380_s7 = sand.u32 (!%p1601_p5), 1, %s1129_s25   ;;  %p1602_p9 = scmp.ne.s32.totalorder (!%p1601_p5), %s1587_s11, 0 }
  0x60   : > { %301 = sbr.rel (%p1601_p5) target bundleno = 806 (0x326), region = 40  ;;  %s1383_s17 = sshll.u32 (!%p1601_p5), %s1380_s7, 4 }
  0x61   : > { %s304_s5 = scalar_lea.sflag (!%p1601_p5), [#allocation3], %s1380_s7  ;;  %s307_s29 = scalar_lea.vmem (!%p1601_p5), [#allocation2], %s1383_s17 }
  0x67   : > { %1108 = dma.done.wait (%p1602_p9), %s304_s5, 256  }
  0x68   : > { %1110 = vsyncadd (%p1602_p9), %s304_s5, 4294967040  ;;  %p1603_p0 = scmp.eq.s32.totalorder %s1247_s9, 0 }
  0x6a   : > { %1112 = dma.done.wait (%p1603_p0), [#allocation6], 512   ;;  %p1604_p6 = pmov %p1603_p0 }
  0x6b   : > { %vm358_vm0 = vcmask 261120   ;;  %v356_v0 = vld [vmem:[%s307_s29] sm:$0xff]  ;;  %v357_v1 = vld [vmem:[%s307_s29 + $0x8] sm:$0xff]  ;;  %s784_s3 = sshll.u32 %s1137_s27, 1  ;;  %s785_s18 = sshll.u32 %s1141_s28, 2 }
  0x6c   : > { %1114 = vsyncadd (%p1604_p6), [#allocation6], 4294966784  ;;  %v359_v2 = vsel %vm358_vm0, %v356_v0, 0.0  ;;  %v362_v3 = vsel %vm358_vm0, %v357_v1, 0.0  ;;  %v418_v14 = vld [vmem:[#allocation5] sm:$0xff]  ;;  %v419_v15 = vld [vmem:[#allocation5 + $0x8] sm:$0xff]  ;;  %s555_s22 = sadd.s32 %s785_s18, %s784_s3 }
  0x6d   : > { %360 = vadd.xlane.f32.xlu0 %v359_v2  ;;  %v420_v16 = vld [vmem:[#allocation5 + $0x10] sm:$0xff]  ;;  %v812_v17 = vpack.c.bf16 %v419_v15, %v418_v14  ;;  %v421_v18 = vld [vmem:[#allocation5 + $0x18] sm:$0xff]  ;;  %v776_v36 = vld [vmem:[%s1560_s1] ss:$0 sm:$0xff]  ;;  %s1412_s23 = sshll.u32 %s555_s22, 7  ;;  %s337_s16 = scalar_lea.vmem [#allocation7], %s1383_s17 }
  0x6e   : > { %v816_v19 = vpack.c.bf16 %v421_v18, %v420_v16  ;;  %v777_v39 = vld [vmem:[%s1561_s2] ss:$0 sm:$0xff]  ;;  %s558_s15 = sshll.u32 %s337_s16, 4  ;;  %s1159_s19 = smov 96   ;;  %s1422_s15 = int_to_ptr.vmem [resolvable:$true] %s558_s15 }
  0x6f   : > { %813 = vmatprep.subr.bf16.mxu0 %v812_v17  ;;  %v778_v46 = vld [vmem:[%s1563_s4] ss:$0 sm:$0xff]  ;;  %s1605_s20 = sld [smem:[#allocation21_spill]]  ;;  %s1160_s29 = smov 64  }
  0x70   : > { %815 = vmatpush3.bf16.msra.mxu0 %v812_v17  ;;  %s533_s11 = scalar_lea.sflag [#allocation4], %s1380_s7  ;;  %s991_s12 = scalar_lea.vmem %s1422_s15, 256 }
  0x71   : > { %363 = vadd.xlane.f32.xlu0 %v362_v3  ;;  %817 = vmatprep.subr.bf16.mxu0 %v816_v19  ;;  %p992_p8 = scmp.ne.s32.totalorder %s1422_s15, %s991_s12  ;;  %s1161_s13 = smov [#allocation7]  }
  0x72   : > { %s995_s10 = sshll.u32 %s1161_s13, 4  ;;  %s996_s10 = int_to_ptr.vmem [resolvable:$false] %s995_s10 }
  0x73   : > { %p993_p10 = pnand %p992_p8, %p1312_p11  ;;  %s997_s3 = scalar_lea.vmem %s996_s10, 512 }
  0x74   : > { %819 = vmatpush3.bf16.msra.mxu0 %v816_v19  ;;  %p998_p13 = scmp.lt.s32.totalorder %s1422_s15, %s996_s10  ;;  %p999_p3 = scmp.lt.s32.totalorder %s997_s3, %s991_s12 }
  0x75   : > { %s1420_s5 = scalar_lea.hbm %s1605_s20, %s1412_s23  ;;  %p994_p12 = pneg %p993_p10 }
  0x76   : > { %p1000_p7 = por %p999_p3, %p998_p13 }
  0x78   : > { %p1001_p1 = pnand %p1000_p7, %p994_p12 }
  0xfa   : > { %v361_v4 = vpop.xlane.xlu0 %360 }
  0xfb   : > { %v366_v5 = vmul.f32 0.03125, %v361_v4 }
  0xfd   : > { %v368_v6 = vsub.f32 %v356_v0, %v366_v5 }
  0xfe   : > { %v364_v7 = vpop.xlane.xlu0 %363 }
  0xff   : > { %v367_v8 = vmul.f32 0.03125, %v364_v7  ;;  %v370_v9 = vmul.f32 %v368_v6, %v368_v6  ;;  %v405_v37 = vmul.f32 %v776_v36, %v368_v6 }
 0x101   : > { %v369_v10 = vsub.f32 %v357_v1, %v367_v8  ;;  %v372_v11 = vsel %vm358_vm0, %v370_v9, 0.0 }
 0x102   : > { %373 = vadd.xlane.f32.xlu1 %v372_v11 }
 0x103   : > { %v371_v12 = vmul.f32 %v369_v10, %v369_v10  ;;  %v406_v41 = vmul.f32 %v776_v36, %v369_v10 }
 0x105   : > { %v375_v13 = vsel %vm358_vm0, %v371_v12, 0.0 }
 0x106   : > { %376 = vadd.xlane.f32.xlu1 %v375_v13 }
 0x18f   : > { %v374_v20 = vpop.xlane.xlu1 %373 }
 0x190   : > { %v378_v21 = vmul.f32 0.032258064, %v374_v20 }
 0x192   : > { %925 = vrsqrt.f32 %v378_v21  ;;  %vm382_vm1 = vcmp.eq.f32.partialorder %v378_v21, inf  ;;  %v385_v26 = vand.u32 2147483648, %v378_v21  ;;  %vm384_vm2 = vcmp.eq.f32.partialorder %v378_v21, 0.0 }
 0x193   : > { %v377_v22 = vpop.xlane.xlu1 %376 }
 0x194   : > { %v379_v23 = vmul.f32 0.032258064, %v377_v22 }
 0x196   : > { %927 = vrsqrt.f32 %v379_v23  ;;  %vm389_vm3 = vcmp.eq.f32.partialorder %v379_v23, inf  ;;  %v392_v32 = vand.u32 2147483648, %v379_v23  ;;  %vm391_vm4 = vcmp.eq.f32.partialorder %v379_v23, 0.0 }
 0x19c   : > { %v926_v24 = vpop.eup %925 }
 0x19d   : > { %v381_v25 = vmul.f32 %v926_v24, %v378_v21 }
 0x19f   : > { %v383_v27 = vsel %vm382_vm1, %v378_v21, %v381_v25 }
 0x1a0   : > { %v928_v28 = vpop.eup %927  ;;  %v386_v29 = vsel %vm384_vm2, %v385_v26, %v383_v27 }
 0x1a1   : > { %v388_v30 = vmul.f32 %v928_v28, %v379_v23  ;;  %v394_v31 = vadd.f32 1e-06, %v386_v29 }
 0x1a3   : > { %v390_v33 = vsel %vm389_vm3, %v379_v23, %v388_v30  ;;  %929 = vrcp.f32 %v394_v31 }
 0x1a4   : > { %v393_v34 = vsel %vm391_vm4, %v392_v32, %v390_v33 }
 0x1a5   : > { %v395_v35 = vadd.f32 1e-06, %v393_v34 }
 0x1a7   : > { %931 = vrcp.f32 %v395_v35 }
 0x1ad   : > { %v930_v38 = vpop.eup %929 }
 0x1ae   : > { %v407_v40 = vmul.f32 %v930_v38, %v405_v37 }
 0x1b0   : > { %v416_v42 = vadd.f32 %v777_v39, %v407_v40 }
 0x1b1   : > { %v932_v43 = vpop.eup %931 }
 0x1b2   : > { %v408_v44 = vmul.f32 %v932_v43, %v406_v41  ;;  %809 = vmatprep.mubr.msk.f32.mxu0 %vm358_vm0, %v416_v42 }
 0x1b4   : > { %v417_v45 = vadd.f32 %v777_v39, %v408_v44 }
 0x1b6   : > { %810 = vmatmul.mubr.msk.f32.vlgmr.msra.gmra.mrb[0].mxu0 %vm358_vm0, %v417_v45 }
 0x289   : > { %v811_v47 = vpop.f32.mrb[0].mxu0 }
 0x28a   : > { %v507_v48 = vadd.f32 %v811_v47, %v778_v46  ;;  %v501_v49 = vpop.f32.mrb[1].mxu0 }
 0x28b   : > { %v502_v50 = vadd.f32 %v778_v46, %v501_v49 }
 0x28c   : > { %v511_v51 = vmul.f32 0.35355338, %v507_v48  ;;  %518 = vrot.lane.b32.xlu1 %v507_v48, %s1159_s19 }
 0x28d   : > { %v510_v52 = vmul.f32 0.35355338, %v502_v50  ;;  %516 = vrot.lane.b32.xlu0 %v502_v50, %s1159_s19 }
 0x28e   : > { %513 = vst.msk [vmem:[%s337_s16 + $0x8] sm:$0xff] %vm358_vm0, %v511_v51 }
 0x28f   : > { %512 = vst.msk [vmem:[%s337_s16] sm:$0xff] %vm358_vm0, %v510_v52 }
 0x290   : > { %524 = vrot.lane.b32.xlu1 %v502_v50, %s1160_s29 }
 0x291   : > { %1004 = shalt.err (!%p1001_p1)
}
 0x292   : > { %s1005_s18 = scalar_lea.hbm %s1420_s5, 256  ;;  %s1009_s22 = scalar_lea.hbm %s1605_s20, 1024 }
 0x293   : > { %p1006_p2 = scmp.ne.s32.totalorder %s1420_s5, %s1005_s18  ;;  %p1010_p9 = scmp.lt.u32.totalorder %s1420_s5, %s1605_s20 }
 0x294   : > { %p1011_p0 = scmp.lt.u32.totalorder %s1009_s22, %s1005_s18  ;;  %p1013_p8 = scmp.lt.u32.totalorder %s1005_s18, %s1420_s5 }
 0x295   : > { %p1007_p4 = pnand %p1006_p2, %p1312_p11 }
 0x296   : > { %p1012_p6 = por %p1011_p0, %p1010_p9 }
 0x297   : > { %p1008_p5 = pneg %p1007_p4 }
 0x298   : > { %p1014_p10 = por %p1013_p8, %p1012_p6 }
 0x29a   : > { %p1015_p12 = pnand %p1014_p10, %p1008_p5 }
 0x29c   : > { %1018 = shalt.err (!%p1015_p12)
}
 0x29d   : > { %s1162_s27 = smov 128   ;;  %s1163_s28 = smov 8   ;;  %526 = vrot.lane.b32.xlu1 %v507_v48, %s1160_s29 }
 0x29e   : > { %826 = dma.vmem_to_hbm [thread:$0]  (%p1312_p11), %s1422_s15, 256, %s1420_s5, %s533_s11, %s1162_s27, %s1162_s27, %s1163_s28  }
 0x29f   : > { %s344_s12 = scalar_lea.vmem [#allocation8], %s1383_s17  ;;  %s537_s10 = sand.u32 1, %s1247_s9  }
 0x2a0   : > { %s576_s13 = sshll.u32 %s344_s12, 4  ;;  %s1606_s6 = sld [smem:[#allocation22_spill]]  ;;  %s1456_s13 = int_to_ptr.vmem [resolvable:$true] %s576_s13 }
 0x2a1   : > { %s1466_s7 = scalar_lea.sflag [#allocation9], %s537_s10  ;;  %s1019_s15 = scalar_lea.vmem %s1456_s13, 256 }
 0x2a2   : > { %p1020_p13 = scmp.ne.s32.totalorder %s1456_s13, %s1019_s15  ;;  %s1164_s9 = smov [#allocation8]  }
 0x2a3   : > { %s1023_s5 = sshll.u32 %s1164_s9, 4  ;;  %s1024_s5 = int_to_ptr.vmem [resolvable:$false] %s1023_s5 }
 0x2a4   : > { %p1021_p3 = pnand %p1020_p13, %p1312_p11  ;;  %s1025_s29 = scalar_lea.vmem %s1024_s5, 512 }
 0x2a5   : > { %p1026_p1 = scmp.lt.s32.totalorder %s1456_s13, %s1024_s5  ;;  %p1027_p2 = scmp.lt.s32.totalorder %s1025_s29, %s1019_s15 }
 0x2a6   : > { %s1462_s21 = scalar_lea.hbm %s1606_s6, %s1412_s23  ;;  %p1022_p7 = pneg %p1021_p3 }
 0x2a7   : > { %p1028_p4 = por %p1027_p2, %p1026_p1 }
 0x2a9   : > { %p1029_p5 = pnand %p1028_p4, %p1022_p7 }
 0x2fe   : > { %v519_v53 = vpop.permute.xlu1 %518 }
 0x2ff   : > { %523 = vst.msk [vmem:[%s344_s12 + $0x8] sm:$0xff] %vm358_vm0, %v519_v53  ;;  %v517_v54 = vpop.permute.xlu0 %516 }
 0x300   : > { %522 = vst.msk [vmem:[%s344_s12] sm:$0xff] %vm358_vm0, %v517_v54 }
 0x301   : > { %1032 = shalt.err (!%p1029_p5)
}
 0x302   : > { %s1033_s11 = scalar_lea.hbm %s1462_s21, 256  ;;  %s1037_s19 = scalar_lea.hbm %s1606_s6, 1024 }
 0x303   : > { %p1034_p9 = scmp.ne.s32.totalorder %s1462_s21, %s1033_s11  ;;  %p1038_p8 = scmp.lt.u32.totalorder %s1462_s21, %s1606_s6 }
 0x304   : > { %p1039_p10 = scmp.lt.u32.totalorder %s1037_s19, %s1033_s11  ;;  %p1041_p13 = scmp.lt.u32.totalorder %s1033_s11, %s1462_s21 }
 0x305   : > { %p1035_p0 = pnand %p1034_p9, %p1312_p11 }
 0x306   : > { %p1040_p12 = por %p1039_p10, %p1038_p8 }
 0x307   : > { %p1036_p6 = pneg %p1035_p0 }
 0x308   : > { %p1042_p3 = por %p1041_p13, %p1040_p12 }
 0x30a   : > { %p1043_p7 = pnand %p1042_p3, %p1036_p6 }
 0x30c   : > { %1046 = shalt.err (!%p1043_p7)
}
 0x30d   : > { %827 = dma.vmem_to_hbm [thread:$0]  (%p1312_p11), %s1456_s13, 256, %s1462_s21, %s1466_s7, %s1162_s27, %s1162_s27, %s1163_s28   ;;  %v525_v55 = vpop.permute.xlu1 %524 }
 0x30e   : > { %s351_s3 = scalar_lea.vmem [#allocation10], %s1383_s17  ;;  %s1607_s5 = sld [smem:[#allocation23_spill]] }
 0x30f   : > { %s594_s18 = sshll.u32 %s351_s3, 4  ;;  %530 = vst.msk [vmem:[%s351_s3] sm:$0xff] %vm358_vm0, %v525_v55  ;;  %s1165_s17 = smov [#allocation10]   ;;  %s1495_s18 = int_to_ptr.vmem [resolvable:$true] %s594_s18 }
 0x310   : > { %s1047_s11 = scalar_lea.vmem %s1495_s18, 256  ;;  %s1051_s13 = sshll.u32 %s1165_s17, 4  ;;  %s1052_s13 = int_to_ptr.vmem [resolvable:$false] %s1051_s13 }
 0x311   : > { %v527_v56 = vpop.permute.xlu1 %526  ;;  %p1048_p1 = scmp.ne.s32.totalorder %s1495_s18, %s1047_s11  ;;  %s1053_s21 = scalar_lea.vmem %s1052_s13, 512 }
 0x312   : > { %531 = vst.msk [vmem:[%s351_s3 + $0x8] sm:$0xff] %vm358_vm0, %v527_v56  ;;  %p1054_p5 = scmp.lt.s32.totalorder %s1495_s18, %s1052_s13  ;;  %p1055_p9 = scmp.lt.s32.totalorder %s1053_s21, %s1047_s11 }
 0x313   : > { %p1049_p2 = pnand %p1048_p1, %p1312_p11 }
 0x314   : > { %s1501_s29 = scalar_lea.hbm %s1607_s5, %s1412_s23  ;;  %p1056_p0 = por %p1055_p9, %p1054_p5 }
 0x315   : > { %p1050_p4 = pneg %p1049_p2 }
 0x317   : > { %p1057_p6 = pnand %p1056_p0, %p1050_p4 }
 0x319   : > { %1060 = shalt.err (!%p1057_p6)
}
 0x31a   : > { %s1061_s23 = scalar_lea.hbm %s1501_s29, 256  ;;  %s1065_s19 = scalar_lea.hbm %s1607_s5, 1024 }
 0x31b   : > { %p1062_p8 = scmp.ne.s32.totalorder %s1501_s29, %s1061_s23  ;;  %p1066_p13 = scmp.lt.u32.totalorder %s1501_s29, %s1607_s5 }
 0x31c   : > { %p1067_p3 = scmp.lt.u32.totalorder %s1065_s19, %s1061_s23  ;;  %p1069_p1 = scmp.lt.u32.totalorder %s1061_s23, %s1501_s29 }
 0x31d   : > { %p1063_p10 = pnand %p1062_p8, %p1312_p11 }
 0x31e   : > { %p1068_p7 = por %p1067_p3, %p1066_p13 }
 0x31f   : > { %p1064_p12 = pneg %p1063_p10 }
 0x320   : > { %p1070_p2 = por %p1069_p1, %p1068_p7 }
 0x322   : > { %p1071_p4 = pnand %p1070_p2, %p1064_p12 }
 0x324   : > { %1074 = shalt.err (!%p1071_p4)
}
 0x325   : > { %828 = dma.vmem_to_hbm [thread:$0]  (%p1312_p11), %s1495_s18, 256, %s1501_s29, %s1466_s7, %s1162_s27, %s1162_s27, %s1163_s28  }
 0x326 PF: > { %s1608_s3 = sld [smem:[#allocation15_spill]]  ;;  %s1609_s15 = sld [smem:[#allocation17_spill]] }
 0x327   : > { %p853_p5 = scmp.ge.s32.totalorder %s1153_s8, 2 }
 0x32c   : > { %s609_s9 = sand.u32 1, %s1608_s3   ;;  %p1610_p9 = scmp.ne.s32.totalorder %s1609_s15, 0 }
 0x32d   : > { %s610_s11 = scalar_lea.sflag [#allocation4], %s609_s9 }
 0x32e   : > { %p841_p0 = pnand %p853_p5, %p1610_p9 }
 0x330   : > { %1116 = dma.done.wait (!%p841_p0), %s610_s11, 256  }
 0x331   : > { %1118 = vsyncadd (!%p841_p0), %s610_s11, 4294967040  ;;  %s1611_s14 = sadd.s32 4294967294, %s1153_s8  }
 0x332   : > { %s618_s17 = sand.u32 1, %s1611_s14  }
 0x333   : > { %s619_s13 = scalar_lea.sflag [#allocation9], %s618_s17 }
 0x334   : > { %1120 = dma.done.wait (!%p841_p0), %s619_s13, 512  }
 0x335   : > { %1122 = vsyncadd (!%p841_p0), %s619_s13, 4294966784  ;;  %s28_s8 = sadd.s32 1, %s1153_s8   ;;  %s1612_s27 = smov %s1329_s24 }
 0x336   : > { %p25_p11 = scmp.ge.s32.totalorder %s28_s8, 6   ;;  %s1613_s28 = sld [smem:[#allocation16_spill]] }
 0x337   : > { %s1614_s29 = sld [smem:[#allocation18_spill]]  ;;  %s1615_s7 = sld [smem:[#allocation19_spill]] }
 0x338   : > { %s1616_s24 = smov %s1129_s25  ;;  %s1617_s25 = smov %s1133_s26 }
 0x339   : > { %s1618_s26 = smov %s1612_s27  ;;  %27 = sbr.rel (!%p25_p11) target bundleno = 15 (0xf), region = 121 }
 0x33c   : > { %s1619_s27 = smov %s1613_s28  ;;  %s1620_s28 = smov %s1149_s30 }
 0x33d   : > { %s1621_s30 = smov %s1615_s7 }
 0x340   :  { %633 = vsyncpa [#allocation3], 1 }
 0x341   :  { %635 = vsyncpa [#allocation3 + $0x1], 1 }
 0x342   :  { %636 = vsyncpa [#allocation6], 1 }
 0x343   :  { %637 = vsyncpa [#allocation4], 1 }
 0x344   :  { %639 = vsyncpa [#allocation4 + $0x1], 1 }
 0x345   :  { %640 = vsyncpa [#allocation9], 1 }
 0x346   :  { %642 = vsyncpa [#allocation9 + $0x1], 1 }

</bundles_post_ra>
